<compile_context>
chip_gen: v7x
topology: tpu7x:2x2x1
jax: 0.10.0
libtpu: 0.0.40
codegen_flags: <defaults>
</compile_context>

<pallas_src>
import numpy as np
import jax
import jax.numpy as jnp
from jax.experimental import pallas as pl
from jax.experimental.pallas import tpu as pltpu

OUT_FEATURES = 3          # real fc3 width
OUT_FEATURES_PAD = 128    # lane-dense padded fc3 width


# ----------------------------------------------------------------------------
# Single fused kernel:
#   (conv_transpose + avg_pool + flatten + fc1) -> relu -> fc2 -> relu -> fc3
# Three bf16 MXU matmuls with f32 accumulation + two VPU relus.
# ----------------------------------------------------------------------------
def fused_kernel(x_ref, wf_ref, bf_ref, w2_ref, b2_ref, w3_ref, b3_ref, o_ref):
    x = x_ref[...].astype(jnp.bfloat16)
    h = jnp.dot(x, wf_ref[...],
                preferred_element_type=jnp.float32) + bf_ref[...]
    h = jnp.maximum(h, 0.0).astype(jnp.bfloat16)
    h = jnp.dot(h, w2_ref[...],
                preferred_element_type=jnp.float32) + b2_ref[...]
    h = jnp.maximum(h, 0.0).astype(jnp.bfloat16)
    o_ref[...] = jnp.dot(h, w3_ref[...],
                         preferred_element_type=jnp.float32) + b3_ref[...]


def fused_forward(x_flat, wf, bf, w2, b2, w3, b3):
    B, D0 = x_flat.shape
    D1 = wf.shape[1]
    D2 = w2.shape[1]
    D3 = w3.shape[1]
    out_shape = jax.ShapeDtypeStruct((B, D3), jnp.float32)

    TM = 256  # M tile: multiple of 128 (v5e MXU) and matches v6e/v7x 256x256 MXU
    if B % TM == 0:
        # Large-batch path: M-tiled "parallel" grid; weights stay resident
        # across tiles (index_map returns (0,0) every step).
        return pl.pallas_call(
            fused_kernel,
            out_shape=out_shape,
            grid=(B // TM,),
            in_specs=[
                pl.BlockSpec((TM, D0), lambda i: (i, 0)),
                pl.BlockSpec((D0, D1), lambda i: (0, 0)),
                pl.BlockSpec((1, D1), lambda i: (0, 0)),
                pl.BlockSpec((D1, D2), lambda i: (0, 0)),
                pl.BlockSpec((1, D2), lambda i: (0, 0)),
                pl.BlockSpec((D2, D3), lambda i: (0, 0)),
                pl.BlockSpec((1, D3), lambda i: (0, 0)),
            ],
            out_specs=pl.BlockSpec((TM, D3), lambda i: (i, 0)),
            compiler_params=pltpu.CompilerParams(
                dimension_semantics=("parallel",)),
        )(x_flat, wf, bf, w2, b2, w3, b3)

    # Small / ragged batch: one step, whole arrays resident in VMEM.
    # No grid => no redundant double-buffering of the (static) weights.
    return pl.pallas_call(
        fused_kernel,
        out_shape=out_shape,
    )(x_flat, wf, bf, w2, b2, w3, b3)


# ----------------------------------------------------------------------------
# One-time parameter preparation (hoisted out of the per-call forward).
# ----------------------------------------------------------------------------
def prepare_params(params, H, W):
    wt, bt, w1, b1, w2, b2, w3, b3 = params
    Cin, Cout = wt.shape[0], wt.shape[1]
    D1 = w1.shape[1]

    # 9-tap collapse: AvgPool over the disjoint 3x3 conv-transpose block equals
    # the mean of the 9 tap contributions -> one averaged (Cin, Cout) matrix.
    w_avg = wt.mean(axis=(2, 3))                                  # (Cin, Cout)

    # Fold (x @ w_avg + bt), the PyTorch NCHW flatten, and fc1 into a single
    # (Cin*H*W, 256) matrix + bias, ordered so x is consumed in its natural
    # NCHW flatten order (no transpose in the forward pass).
    w1_r = w1.reshape(Cout, H * W, D1)                            # rows: co*H*W + p
    wf = jnp.einsum('ic,cpo->ipo', w_avg, w1_r).reshape(Cin * H * W, D1)
    bf = b1.reshape(1, D1) + jnp.einsum('c,cpo->o', bt, w1_r)[None, :]

    # fc3 padded to 128 output lanes -> lane-dense stores in-kernel.
    D2, D3 = w3.shape
    w3p = jnp.zeros((D2, OUT_FEATURES_PAD), jnp.float32).at[:, :D3].set(w3)
    b3p = jnp.zeros((1, OUT_FEATURES_PAD), jnp.float32).at[:, :D3].set(b3)

    # bf16 weight storage (halves weight DMA; MXU accumulates in f32).
    # Biases stay f32: they add directly into the f32 accumulators.
    return (wf.astype(jnp.bfloat16),
            bf.astype(jnp.float32),
            w2.astype(jnp.bfloat16),
            b2.astype(jnp.float32),
            w3p.astype(jnp.bfloat16),
            b3p.astype(jnp.float32))


def model_forward(x_nchw, prepped):
    B = x_nchw.shape[0]
    x_flat = x_nchw.reshape(B, -1)          # NCHW flatten; no data movement
    out_padded = fused_forward(x_flat, *prepped)
    return out_padded[:, :OUT_FEATURES]


# ----------------------------------------------------------------------------
# Pure-JAX reference (literal conv_transpose -> avgpool -> MLP) for checking.
# ----------------------------------------------------------------------------
def reference_forward(x_nchw, params):
    B, Cin, H, W = x_nchw.shape
    wt, bt, w1, b1, w2, b2, w3, b3 = params
    Cout = wt.shape[1]
    # conv_transpose, stride=3, kernel=3: disjoint 3x3 blocks per input pixel
    y = jnp.einsum('bchw,cokl->bohkwl', x_nchw, wt)               # (B,Co,H,3,W,3)
    y = y.reshape(B, Cout, 3 * H, 3 * W) + bt[None, :, None, None]
    # avg pool 3x3 stride 3
    p = y.reshape(B, Cout, H, 3, W, 3).mean(axis=(3, 5))          # (B,Co,H,W)
    flat = p.reshape(B, Cout * H * W)
    h = jnp.maximum(flat @ w1 + b1, 0.0)
    h = jnp.maximum(h @ w2 + b2, 0.0)
    return h @ w3 + b3


# ----------------------------------------------------------------------------
def init_params(key):
    Cin, Cout = 3, 32
    ks = jax.random.split(key, 8)

    def u(k, shape, fan_in):
        bound = 1.0 / np.sqrt(fan_in)
        return jax.random.uniform(k, shape, jnp.float32, -bound, bound)

    # ConvTranspose2d weight: (in_channels, out_channels, kh, kw)
    wt = u(ks[0], (Cin, Cout, 3, 3), Cin * 9)
    bt = u(ks[1], (Cout,), Cin * 9)
    # Linear weights stored already transposed: (in_features, out_features)
    w1 = u(ks[2], (3264, 256), 3264)
    b1 = u(ks[3], (1, 256), 3264)
    w2 = u(ks[4], (256, 128), 256)
    b2 = u(ks[5], (1, 128), 256)
    w3 = u(ks[6], (128, 3), 128)
    b3 = u(ks[7], (1, 3), 128)
    return (wt, bt, w1, b1, w2, b2, w3, b3)


if __name__ == "__main__":
    key = jax.random.PRNGKey(0)
    pkey, xkey_s, xkey_l = jax.random.split(key, 3)
    params = init_params(pkey)

    # Input shape consistent with fc1's 3264 features: (B, 3, 6, 17)
    #   conv_t (stride 3): (18, 51);  avgpool (3,3): (6, 17);  32*6*17 = 3264.
    Cin, H, W = 3, 6, 17

    # Weight folding / quantization is done once, outside the forward pass.
    prepped = prepare_params(params, H, W)
    prepped = tuple(jax.block_until_ready(p) for p in prepped)

    # Small batch: exercises the no-grid whole-array path.
    B_small = 2
    x_small = jax.random.normal(xkey_s, (B_small, Cin, H, W), dtype=jnp.float32)
    out_small = jax.block_until_ready(model_forward(x_small, prepped))
    ref_small = reference_forward(x_small, params)
    assert out_small.shape == (B_small, OUT_FEATURES), out_small.shape
    # bf16 weight storage is a deliberate perf choice -> ~0.5% quantization
    # error vs the f32 reference; tolerance chosen with ample margin.
    np.testing.assert_allclose(np.asarray(out_small), np.asarray(ref_small),
                               rtol=2e-2, atol=2e-2)

    # Larger batch: exercises the M-tiled "parallel" grid path (256-row tiles).
    B_large = 512
    x_large = jax.random.normal(xkey_l, (B_large, Cin, H, W), dtype=jnp.float32)
    out_large = jax.block_until_ready(model_forward(x_large, prepped))
    ref_large = reference_forward(x_large, params)
    assert out_large.shape == (B_large, OUT_FEATURES), out_large.shape
    np.testing.assert_allclose(np.asarray(out_large), np.asarray(ref_large),
                               rtol=2e-2, atol=2e-2)

    print("KERNEL_OK")
</pallas_src>

<mosaic_0001>
module attributes {stable_mosaic.version = 11 : i64} {
  func.func @fused_kernel(%arg0: memref<2x306xf32, #tpu.memory_space<vmem>>, %arg1: memref<306x256xbf16, #tpu.memory_space<vmem>>, %arg2: memref<1x256xf32, #tpu.memory_space<vmem>>, %arg3: memref<256x128xbf16, #tpu.memory_space<vmem>>, %arg4: memref<1x128xf32, #tpu.memory_space<vmem>>, %arg5: memref<128x128xbf16, #tpu.memory_space<vmem>>, %arg6: memref<1x128xf32, #tpu.memory_space<vmem>>, %arg7: memref<2x128xf32, #tpu.memory_space<vmem>>) attributes {dimension_semantics = [], scalar_prefetch = 0 : i64, scratch_operands = 0 : i64, tpu.core_type = #tpu.core_type<tc>} {
    %c0 = arith.constant 0 : index
    %c0_0 = arith.constant 0 : index
    %0 = vector.load %arg0[%c0, %c0_0] : memref<2x306xf32, #tpu.memory_space<vmem>>, vector<2x306xf32>
    %1 = arith.truncf %0 : vector<2x306xf32> to vector<2x306xbf16>
    %c0_1 = arith.constant 0 : index
    %c0_2 = arith.constant 0 : index
    %2 = vector.load %arg1[%c0_1, %c0_2] : memref<306x256xbf16, #tpu.memory_space<vmem>>, vector<306x256xbf16>
    %cst = arith.constant dense<0.000000e+00> : vector<2x256xf32>
    %3 = tpu.matmul %1, %2, %cst {dimension_numbers = #tpu.dot_dimension_numbers<[1], [0], [0], [1], [0, 0, 1, 1], [], []>} : vector<2x306xbf16>, vector<306x256xbf16>, vector<2x256xf32> -> vector<2x256xf32>
    %c0_3 = arith.constant 0 : index
    %c0_4 = arith.constant 0 : index
    %4 = vector.load %arg2[%c0_3, %c0_4] : memref<1x256xf32, #tpu.memory_space<vmem>>, vector<1x256xf32>
    %5 = vector.broadcast %4 : vector<1x256xf32> to vector<2x256xf32>
    %6 = arith.addf %3, %5 : vector<2x256xf32>
    %cst_5 = arith.constant 0.000000e+00 : f32
    %7 = vector.broadcast %cst_5 : f32 to vector<2x256xf32>
    %8 = arith.maximumf %6, %7 : vector<2x256xf32>
    %9 = arith.truncf %8 : vector<2x256xf32> to vector<2x256xbf16>
    %c0_6 = arith.constant 0 : index
    %c0_7 = arith.constant 0 : index
    %10 = vector.load %arg3[%c0_6, %c0_7] : memref<256x128xbf16, #tpu.memory_space<vmem>>, vector<256x128xbf16>
    %cst_8 = arith.constant dense<0.000000e+00> : vector<2x128xf32>
    %11 = tpu.matmul %9, %10, %cst_8 {dimension_numbers = #tpu.dot_dimension_numbers<[1], [0], [0], [1], [0, 0, 1, 1], [], []>} : vector<2x256xbf16>, vector<256x128xbf16>, vector<2x128xf32> -> vector<2x128xf32>
    %c0_9 = arith.constant 0 : index
    %c0_10 = arith.constant 0 : index
    %12 = vector.load %arg4[%c0_9, %c0_10] : memref<1x128xf32, #tpu.memory_space<vmem>>, vector<1x128xf32>
    %13 = vector.broadcast %12 : vector<1x128xf32> to vector<2x128xf32>
    %14 = arith.addf %11, %13 : vector<2x128xf32>
    %cst_11 = arith.constant 0.000000e+00 : f32
    %15 = vector.broadcast %cst_11 : f32 to vector<2x128xf32>
    %16 = arith.maximumf %14, %15 : vector<2x128xf32>
    %17 = arith.truncf %16 : vector<2x128xf32> to vector<2x128xbf16>
    %c0_12 = arith.constant 0 : index
    %c0_13 = arith.constant 0 : index
    %18 = vector.load %arg5[%c0_12, %c0_13] : memref<128x128xbf16, #tpu.memory_space<vmem>>, vector<128x128xbf16>
    %cst_14 = arith.constant dense<0.000000e+00> : vector<2x128xf32>
    %19 = tpu.matmul %17, %18, %cst_14 {dimension_numbers = #tpu.dot_dimension_numbers<[1], [0], [0], [1], [0, 0, 1, 1], [], []>} : vector<2x128xbf16>, vector<128x128xbf16>, vector<2x128xf32> -> vector<2x128xf32>
    %c0_15 = arith.constant 0 : index
    %c0_16 = arith.constant 0 : index
    %20 = vector.load %arg6[%c0_15, %c0_16] : memref<1x128xf32, #tpu.memory_space<vmem>>, vector<1x128xf32>
    %21 = vector.broadcast %20 : vector<1x128xf32> to vector<2x128xf32>
    %22 = arith.addf %19, %21 : vector<2x128xf32>
    %c0_17 = arith.constant 0 : index
    %c0_18 = arith.constant 0 : index
    %23 = vector.load %arg7[%c0_17, %c0_18] : memref<2x128xf32, #tpu.memory_space<vmem>>, vector<2x128xf32>
    tpu.vector_store %arg7[%c0_17, %c0_18], %22 {strides = array<i32>} : memref<2x128xf32, #tpu.memory_space<vmem>>, vector<2x128xf32>,
    return
  }
}

</mosaic_0001>

<bundles_post_ra>
// kernel: tpu_custom_call.1
= control target key start
LH: loop header
LB: loop body
LE: loop exit
PB: predicated region body
PF: predicated region fallthrough
CT: control target
= control target key end

     0   :  { %12 = vsyncpa [#allocation3], 0  ;;  %s1236_s0 = inlined_call_operand.hbm [shape: f32[2,306], index: 0, kind: input, shape index: {}]   ;;  %s1237_s1 = inlined_call_operand.hbm [shape: bf16[306,256], index: 1, kind: input, shape index: {}]   ;;  %s1238_s2 = inlined_call_operand.vmem [shape: f32[1,256], index: 2, kind: input, shape index: {}]   ;;  %s1239_s3 = inlined_call_operand.hbm [shape: bf16[256,128], index: 3, kind: input, shape index: {}]   ;;  %s1240_s4 = inlined_call_operand.vmem [shape: f32[1,128], index: 4, kind: input, shape index: {}]   ;;  %s1241_s5 = inlined_call_operand.hbm [shape: bf16[128,128], index: 5, kind: input, shape index: {}]   ;;  %s1242_s6 = inlined_call_operand.vmem [shape: f32[1,128], index: 6, kind: input, shape index: {}]   ;;  %s1243_s7 = inlined_call_operand.hbm [shape: f32[2,128], index: 7, kind: output, shape index: {}]  }
   0x1   :  { %13 = vsyncpa [#allocation6], 0 }
   0x2   :  { %14 = vsyncpa [#allocation9], 0 }
   0x3   :  { %15 = vsyncpa [#allocation4], 0  ;;  %s1094_s24 = smov [#allocation5]   ;;  %s976_s28 = scalar_lea.hbm %s1237_s1, 4992 }
   0x4   :  { %s31_s25 = sshll.u32 %s1094_s24, 4  ;;  %p977_p0 = scmp.ne.s32.totalorder %s1237_s1, %s976_s28  ;;  %s32_s25 = int_to_ptr.vmem [resolvable:$true] %s31_s25 }
   0x5   :  { %p980_p1 = scmp.lt.u32.totalorder %s976_s28, %s1237_s1 }
   0x7   :  { %p982_p2 = pnand %p980_p1, %p977_p0 }
   0x9   :  { %985 = shalt.err (!%p982_p2)
}
   0xa   :  { %s986_s10 = scalar_lea.vmem %s32_s25, 4992  ;;  %p991_p4 = scmp.lt.s32.totalorder %s32_s25, %s32_s25 }
   0xb   :  { %p987_p3 = scmp.ne.s32.totalorder %s32_s25, %s986_s10  ;;  %p992_p5 = scmp.lt.s32.totalorder %s986_s10, %s986_s10 }
   0xd   :  { %p993_p6 = por %p992_p5, %p991_p4 }
   0xf   :  { %p994_p7 = pnand %p993_p6, %p987_p3 }
  0x11   :  { %997 = shalt.err (!%p994_p7)
}
  0x12   :  { %s1095_s11 = smov 128   ;;  %s1096_s12 = smov 8  }
  0x13   :  { %37 = dma.hbm_to_vmem [thread:$0]  %s1237_s1, 4992, %s32_s25, [#allocation6], %s1095_s11, %s1095_s11, %s1096_s12  }
  0x14   :  { %s1097_s15 = smov [#allocation2]   ;;  %s1098_s17 = smov [#allocation7]  }
  0x15   :  { %s22_s16 = sshll.u32 %s1097_s15, 4  ;;  %s45_s18 = sshll.u32 %s1098_s17, 4  ;;  %s23_s16 = int_to_ptr.vmem [resolvable:$true] %s22_s16  ;;  %s46_s18 = int_to_ptr.vmem [resolvable:$true] %s45_s18 }
  0x16   :  { %s998_s21 = scalar_lea.hbm %s1236_s0, 96 }
  0x17   :  { %p999_p8 = scmp.ne.s32.totalorder %s1236_s0, %s998_s21  ;;  %p1002_p9 = scmp.lt.u32.totalorder %s998_s21, %s1236_s0 }
  0x19   :  { %p1004_p10 = pnand %p1002_p9, %p999_p8 }
  0x1b   :  { %1007 = shalt.err (!%p1004_p10)
}
  0x1c   :  { %s1008_s1 = scalar_lea.vmem %s23_s16, 96  ;;  %p1013_p12 = scmp.lt.s32.totalorder %s23_s16, %s23_s16 }
  0x1d   :  { %p1009_p11 = scmp.ne.s32.totalorder %s23_s16, %s1008_s1  ;;  %p1014_p13 = scmp.lt.s32.totalorder %s1008_s1, %s1008_s1 }
  0x1f   :  { %p1015_p0 = por %p1014_p13, %p1013_p12 }
  0x21   :  { %p1016_p1 = pnand %p1015_p0, %p1009_p11 }
  0x23   :  { %1019 = shalt.err (!%p1016_p1)
}
  0x24   :  { %25 = dma.hbm_to_vmem [thread:$0]  %s1236_s0, 96, %s23_s16, [#allocation3]  }
  0x25   :  { %s1020_s30 = scalar_lea.hbm %s1239_s3, 2048 }
  0x26   :  { %p1021_p2 = scmp.ne.s32.totalorder %s1239_s3, %s1020_s30  ;;  %p1024_p3 = scmp.lt.u32.totalorder %s1020_s30, %s1239_s3 }
  0x28   :  { %p1026_p4 = pnand %p1024_p3, %p1021_p2 }
  0x2a   :  { %1029 = shalt.err (!%p1026_p4)
}
  0x2b   :  { %s1030_s12 = scalar_lea.vmem %s46_s18, 2048  ;;  %p1035_p6 = scmp.lt.s32.totalorder %s46_s18, %s46_s18 }
  0x2c   :  { %p1031_p5 = scmp.ne.s32.totalorder %s46_s18, %s1030_s12  ;;  %p1036_p7 = scmp.lt.s32.totalorder %s1030_s12, %s1030_s12 }
  0x2e   :  { %p1037_p8 = por %p1036_p7, %p1035_p6 }
  0x30   :  { %p1038_p9 = pnand %p1037_p8, %p1031_p5 }
  0x32   :  { %1041 = shalt.err (!%p1038_p9)
}
  0x33   :  { %s1099_s0 = smov 64   ;;  %s1100_s13 = smov 4  }
  0x34   :  { %51 = dma.hbm_to_vmem [thread:$0]  %s1239_s3, 2048, %s46_s18, [#allocation6], %s1099_s0, %s1099_s0, %s1100_s13  }
  0x35   :  { %s1101_s16 = smov [#allocation8]   ;;  %s1042_s21 = scalar_lea.hbm %s1241_s5, 1024 }
  0x36   :  { %s59_s17 = sshll.u32 %s1101_s16, 4  ;;  %p1043_p10 = scmp.ne.s32.totalorder %s1241_s5, %s1042_s21  ;;  %s60_s17 = int_to_ptr.vmem [resolvable:$true] %s59_s17 }
  0x37   :  { %p1046_p11 = scmp.lt.u32.totalorder %s1042_s21, %s1241_s5 }
  0x39   :  { %p1048_p12 = pnand %p1046_p11, %p1043_p10 }
  0x3b   :  { %1051 = shalt.err (!%p1048_p12)
}
  0x3c   :  { %s1052_s1 = scalar_lea.vmem %s60_s17, 1024  ;;  %p1057_p0 = scmp.lt.s32.totalorder %s60_s17, %s60_s17 }
  0x3d   :  { %p1053_p13 = scmp.ne.s32.totalorder %s60_s17, %s1052_s1  ;;  %p1058_p1 = scmp.lt.s32.totalorder %s1052_s1, %s1052_s1 }
  0x3f   :  { %p1059_p2 = por %p1058_p1, %p1057_p0 }
  0x41   :  { %p1060_p3 = pnand %p1059_p2, %p1053_p13 }
  0x43   :  { %1063 = shalt.err (!%p1060_p3)
}
  0x44   :  { %65 = dma.hbm_to_vmem [thread:$0]  %s1241_s5, 1024, %s60_s17, [#allocation9], %s1099_s0, %s1099_s0, %s1100_s13  }
  0x45   :  { %1086 = dma.done.wait [#allocation3], 96  }
  0x46   :  { %1087 = vsyncadd [#allocation3], 4294967200 }
  0x47   :  { %1088 = dma.done.wait [#allocation6], 7040  }
  0x48   :  { %1089 = vsyncadd [#allocation6], 4294960256 }
  0x49   :  { %1090 = dma.done.wait [#allocation9], 1024  }
  0x4a   :  { %1091 = vsyncadd [#allocation9], 4294966272  ;;  %v892_v0 = vld [vmem:[#allocation5 + $0x4] ss:$8 sps:$4 sm:$0xff]   ;;  %v894_v1 = vld [vmem:[#allocation5] ss:$8 sps:$4 sm:$0xff]   ;;  %v87_v9 = vlaneseq }
  0x4b   :  { %362 = vmatprep.subr.bf16.mxu0 %v892_v0  ;;  %v895_v2 = vld [vmem:[#allocation5 + $0x14] ss:$8 sps:$4 sm:$0xff]   ;;  %v897_v3 = vld [vmem:[#allocation5 + $0x10] ss:$8 sps:$4 sm:$0xff]   ;;  %v898_v4 = vld [vmem:[#allocation5 + $0x24] ss:$8 sps:$4 sm:$0xff]  }
  0x4c   :  { %363 = vmatpush1.bf16.msra.mxu0 %v894_v1  ;;  %v900_v5 = vld [vmem:[#allocation5 + $0x20] ss:$8 sps:$4 sm:$0xff]   ;;  %v901_v6 = vld [vmem:[#allocation5 + $0x34] ss:$8 sps:$4 sm:$0xff]   ;;  %v1102_v7 = vmov 1983009808  }
  0x4d   :  { %364 = vmatprep.subr.bf16.mxu0 %v895_v2  ;;  %v85_v8 = vunpack.c.l.s4 %v1102_v7  ;;  %v903_v10 = vld [vmem:[#allocation5 + $0x30] ss:$8 sps:$4 sm:$0xff]   ;;  %v904_v11 = vld [vmem:[#allocation5 + $0x44] ss:$8 sps:$4 sm:$0xff]   ;;  %v1195_v13 = vshrl.u32 %v87_v9, 7  ;;  %v1103_v59 = vmov 0  }
  0x4e   :  { %v906_v14 = vld [vmem:[#allocation5 + $0x40] ss:$8 sps:$4 sm:$0xff]   ;;  %v907_v15 = vld [vmem:[#allocation5 + $0x54] ss:$8 sps:$4 sm:$0xff]   ;;  %v909_v17 = vld [vmem:[#allocation5 + $0x50] ss:$8 sps:$4 sm:$0xff]  }
  0x4f   :  { %v86_v12 = vunpack.c.0.s8 %v85_v8  ;;  %v910_v18 = vld [vmem:[#allocation5 + $0x64] ss:$8 sps:$4 sm:$0xff]   ;;  %v1200_v19 = vld [vmem:[#allocation2] sm:$0x3f]  ;;  %v912_v21 = vld [vmem:[#allocation5 + $0x60] ss:$8 sps:$4 sm:$0xff]  }
  0x50   :  { %365 = vmatpush1.bf16.msra.mxu0 %v897_v3  ;;  %v913_v22 = vld [vmem:[#allocation5 + $0x74] ss:$8 sps:$4 sm:$0xff]   ;;  %v915_v24 = vld [vmem:[#allocation5 + $0x70] ss:$8 sps:$4 sm:$0xff]   ;;  %v916_v25 = vld [vmem:[#allocation5 + $0x84] ss:$8 sps:$4 sm:$0xff]   ;;  %v83_v62 = vcombine.high %v1200_v19, %v1200_v19 }
  0x51   :  { %366 = vmatprep.subr.bf16.mxu0 %v898_v4  ;;  %v1198_v16 = vsub.s32 %v86_v12, %v1195_v13  ;;  %v952_v27 = vld [vmem:[#allocation7 + $0x40] sm:$0xff]   ;;  %v954_v29 = vld [vmem:[#allocation7 + $0x48] sm:$0xff]   ;;  %v956_v32 = vld [vmem:[#allocation7 + $0x50] sm:$0xff]   ;;  %vm355_vm0 = vcmask 1040384   ;;  %vm351_vm1 = vcmask 408576   ;;  %v1104_v9 = vmov 0.0  }
  0x52   :  { %v953_v28 = vld [vmem:[#allocation7] sm:$0xff]   ;;  %v918_v30 = vld [vmem:[#allocation5 + $0x80] ss:$8 sps:$4 sm:$0xff]   ;;  %822 = vmatprep.subr.bf16.mxu1 %v952_v27  ;;  %v958_v36 = vld [vmem:[#allocation7 + $0x58] sm:$0xff]   ;;  %v152_v12 = vsub.s32 1, %v1195_v13  ;;  %vm1105_vm2 = vmmov 0  }
  0x53   :  { %v1204_v20 = vrot.slane %v1200_v19, %v1198_v16  ;;  %823 = vmatpush3.bf16.msra.mxu1 %v953_v28  ;;  %v955_v31 = vld [vmem:[#allocation7 + $0x8] sm:$0xff]   ;;  %v919_v33 = vld [vmem:[#allocation5 + $0x94] ss:$8 sps:$4 sm:$0xff]   ;;  %v921_v34 = vld [vmem:[#allocation5 + $0x90] ss:$8 sps:$4 sm:$0xff]   ;;  %v97_v2 = vrot.slane %v83_v62, %v1198_v16  ;;  %s1106_s30 = smov [#allocation10]  }
  0x54   :  { %367 = vmatpush1.bf16.msra.mxu0 %v900_v5  ;;  %824 = vmatprep.subr.bf16.mxu1 %v954_v29  ;;  %v957_v35 = vld [vmem:[#allocation7 + $0x10] sm:$0xff]   ;;  %v959_v39 = vld [vmem:[#allocation7 + $0x18] sm:$0xff]   ;;  %v960_v41 = vld [vmem:[#allocation7 + $0x60] sm:$0xff]   ;;  %s743_s8 = sshll.u32 %s1106_s30, 4  ;;  %s744_s8 = int_to_ptr.vmem [resolvable:$true] %s743_s8 }
  0x55   :  { %368 = vmatprep.subr.bf16.mxu0 %v901_v6  ;;  %v98_v23 = vcombine.high %v1204_v20, %v1204_v20  ;;  %v922_v37 = vld [vmem:[#allocation5 + $0xa4] ss:$8 sps:$4 sm:$0xff]   ;;  %v924_v38 = vld [vmem:[#allocation5 + $0xa0] ss:$8 sps:$4 sm:$0xff]   ;;  %v925_v40 = vld [vmem:[#allocation5 + $0xb4] ss:$8 sps:$4 sm:$0xff]   ;;  %v102_v55 = vpack.c.bf16 %v1204_v20, %v1204_v20  ;;  %v104_v4 = vpack.c.bf16 %v97_v2, %v97_v2  ;;  %p1069_p5 = scmp.lt.s32.totalorder %s744_s8, %s744_s8 }
  0x56   :  { %v961_v42 = vld [vmem:[#allocation7 + $0x20] sm:$0xff]   ;;  %v962_v44 = vld [vmem:[#allocation7 + $0x68] sm:$0xff]   ;;  %v143_v61 = vld [vmem:[#allocation5 + $0x130] sm:$0x11] }
  0x57   :  { %v103_v26 = vpack.c.bf16 %v98_v23, %v98_v23  ;;  %825 = vmatpush3.bf16.msra.mxu1 %v955_v31  ;;  %v927_v43 = vld [vmem:[#allocation5 + $0xb0] ss:$8 sps:$4 sm:$0xff]   ;;  %v928_v45 = vld [vmem:[#allocation5 + $0xc4] ss:$8 sps:$4 sm:$0xff]   ;;  %v930_v47 = vld [vmem:[#allocation5 + $0xc0] ss:$8 sps:$4 sm:$0xff]   ;;  %v793_v0 = vcombine.high %v143_v61, %v143_v61  ;;  %v792_v1 = vcombine.low %v143_v61, %v143_v61 }
  0x58   :  { %369 = vmatpush1.bf16.msra.mxu0 %v903_v10  ;;  %826 = vmatprep.subr.bf16.mxu1 %v956_v32  ;;  %v963_v46 = vld [vmem:[#allocation7 + $0x28] sm:$0xff]   ;;  %v931_v48 = vld [vmem:[#allocation5 + $0xd4] ss:$8 sps:$4 sm:$0xff]   ;;  %v933_v49 = vld [vmem:[#allocation5 + $0xd0] ss:$8 sps:$4 sm:$0xff]   ;;  %v148_v10 = vsub.s32 0, %v1195_v13 }
  0x59   :  { %370 = vmatprep.subr.bf16.mxu0 %v904_v11  ;;  %394 = vmatprep.mubr.bf16.mxu0 %v103_v26  ;;  %v934_v50 = vld [vmem:[#allocation5 + $0xe4] ss:$8 sps:$4 sm:$0xff]   ;;  %v936_v51 = vld [vmem:[#allocation5 + $0xe0] ss:$8 sps:$4 sm:$0xff]   ;;  %v937_v52 = vld [vmem:[#allocation5 + $0xf4] ss:$8 sps:$4 sm:$0xff]  }
  0x5a   :  { %v939_v53 = vld [vmem:[#allocation5 + $0xf0] ss:$8 sps:$4 sm:$0xff]   ;;  %v943_v54 = vld [vmem:[#allocation5 + $0x104] ss:$8 sps:$4 sm:$0xff]   ;;  %v941_v56 = vld [vmem:[#allocation5 + $0x100] ss:$8 sps:$4 sm:$0xff]  }
  0x5b   :  { %827 = vmatpush3.bf16.msra.mxu1 %v957_v35  ;;  %v946_v57 = vld [vmem:[#allocation5 + $0x114] ss:$8 sps:$4 sm:$0xff]   ;;  %v944_v58 = vld [vmem:[#allocation5 + $0x110] ss:$8 sps:$4 sm:$0xff]   ;;  %v949_v60 = vld [vmem:[#allocation5 + $0x124] ss:$8 sps:$4 sm:$0xff]  }
  0x5c   :  { %371 = vmatpush1.bf16.msra.mxu0 %v906_v14  ;;  %828 = vmatprep.subr.bf16.mxu1 %v958_v36  ;;  %v947_v63 = vld [vmem:[#allocation5 + $0x120] ss:$8 sps:$4 sm:$0xff]   ;;  %v357_v3 = vsel %vm355_vm0, %v792_v1, 0  ;;  %v966_v7 = vld [vmem:[#allocation7 + $0x78] sm:$0xff]   ;;  %v144_v11 = vld [vmem:[%s1238_s2] sm:$0x3] }
  0x5d   :  { %372 = vmatprep.subr.bf16.mxu0 %v907_v15  ;;  %v964_v5 = vld [vmem:[#allocation7 + $0x70] sm:$0xff]   ;;  %v967_v8 = vld [vmem:[#allocation7 + $0x38] sm:$0xff]   ;;  %v149_v14 = vrot.slane %v144_v11, %v148_v10  ;;  %v153_v15 = vrot.slane %v144_v11, %v152_v12  ;;  %v969_v27 = vld [vmem:[#allocation8 + $0x8] sm:$0xff]  }
  0x5e   :  { %v965_v6 = vld [vmem:[#allocation7 + $0x30] sm:$0xff]   ;;  %v971_v28 = vld [vmem:[#allocation8 + $0x18] sm:$0xff]   ;;  %v972_v29 = vld [vmem:[#allocation8 + $0x20] sm:$0xff]  }
  0x5f   :  { %829 = vmatpush3.bf16.msra.mxu1 %v959_v39  ;;  %v970_v13 = vld [vmem:[#allocation8 + $0x10] sm:$0xff]   ;;  %v975_v32 = vld [vmem:[#allocation8 + $0x38] sm:$0xff]  }
  0x60   :  { %373 = vmatpush1.bf16.msra.mxu0 %v909_v17  ;;  %830 = vmatprep.subr.bf16.mxu1 %v960_v41  ;;  %v974_v31 = vld [vmem:[#allocation8 + $0x30] sm:$0xff]  }
  0x61   :  { %374 = vmatprep.subr.bf16.mxu0 %v910_v18 }
  0x63   :  { %831 = vmatpush3.bf16.msra.mxu1 %v961_v42  ;;  %v813_v42 = vld [vmem:[%s1242_s6] ss:$0 sm:$0xff] }
  0x64   :  { %375 = vmatpush1.bf16.msra.mxu0 %v912_v21  ;;  %832 = vmatprep.subr.bf16.mxu1 %v962_v44 }
  0x65   :  { %376 = vmatprep.subr.bf16.mxu0 %v913_v22 }
  0x67   :  { %833 = vmatpush3.bf16.msra.mxu1 %v963_v46 }
  0x68   :  { %377 = vmatpush1.bf16.msra.mxu0 %v915_v24  ;;  %834 = vmatprep.subr.bf16.mxu1 %v964_v5 }
  0x69   :  { %378 = vmatprep.subr.bf16.mxu0 %v916_v25  ;;  %v968_v25 = vld [vmem:[#allocation8] sm:$0xff]  }
  0x6b   :  { %835 = vmatpush3.bf16.msra.mxu1 %v965_v6 }
  0x6c   :  { %379 = vmatpush1.bf16.msra.mxu0 %v918_v30  ;;  %836 = vmatprep.subr.bf16.mxu1 %v966_v7  ;;  %v973_v30 = vld [vmem:[#allocation8 + $0x28] sm:$0xff]  }
  0x6d   :  { %380 = vmatprep.subr.bf16.mxu0 %v919_v33 }
  0x6f   :  { %837 = vmatpush3.bf16.msra.mxu1 %v967_v8 }
  0x70   :  { %381 = vmatpush1.bf16.msra.mxu0 %v921_v34  ;;  %853 = vmatprep.subr.bf16.mxu1 %v1104_v9  ;;  %v796_v34 = vld [vmem:[%s1240_s4] ss:$0 sm:$0xff]  ;;  %s1064_s4 = scalar_lea.vmem %s744_s8, 32 }
  0x71   :  { %382 = vmatprep.subr.bf16.mxu0 %v922_v37  ;;  %p1065_p4 = scmp.ne.s32.totalorder %s744_s8, %s1064_s4  ;;  %p1070_p6 = scmp.lt.s32.totalorder %s1064_s4, %s1064_s4 }
  0x73   :  { %p1071_p7 = por %p1070_p6, %p1069_p5 }
  0x74   :  { %383 = vmatpush1.bf16.msra.mxu0 %v924_v38 }
  0x75   :  { %384 = vmatprep.subr.bf16.mxu0 %v925_v40  ;;  %p1072_p8 = pnand %p1071_p7, %p1065_p4 }
  0x78   :  { %385 = vmatpush1.bf16.msra.mxu0 %v927_v43 }
  0x79   :  { %386 = vmatprep.subr.bf16.mxu0 %v928_v45 }
  0x7c   :  { %387 = vmatpush1.bf16.msra.mxu0 %v930_v47 }
  0x7d   :  { %388 = vmatprep.subr.bf16.mxu0 %v931_v48 }
  0x80   :  { %389 = vmatpush1.bf16.msra.mxu0 %v933_v49 }
  0x81   :  { %390 = vmatprep.subr.bf16.mxu0 %v934_v50 }
  0x84   :  { %391 = vmatpush1.bf16.msra.mxu0 %v936_v51 }
  0x85   :  { %392 = vmatprep.subr.bf16.mxu0 %v937_v52 }
  0x88   :  { %393 = vmatpush1.bf16.msra.mxu0 %v939_v53 }
  0x89   :  { %403 = vmatprep.subr.bf16.mxu0 %v943_v54 }
  0x8b   :  { %395 = vmatmul.mubr.bf16.vlgmr.msra.gmra.mrb[0].mxu0 %v102_v55 }
  0x8c   :  { %404 = vmatpush1.bf16.msra.mxu0 %v941_v56  ;;  %435 = vmatprep.mubr.bf16.mxu0 %v1103_v59 }
  0x8d   :  { %405 = vmatprep.subr.bf16.mxu0 %v946_v57 }
  0x90   :  { %406 = vmatpush1.bf16.msra.mxu0 %v944_v58 }
  0x91   :  { %407 = vmatprep.subr.bf16.mxu0 %v949_v60 }
  0x94   :  { %408 = vmatpush1.bf16.msra.mxu0 %v947_v63 }
  0x95   :  { %794 = vmatprep.subr.msk.bf16.mxu0 %vm355_vm0, %v793_v0 }
  0x98   :  { %410 = vmatpush1.bf16.msra.mxu0 %v357_v3 }
  0x9b   :  { %795 = vmatmul.mubr.msk.bf16.vlgmr.msra.gmra.mrb[0].mxu0 %vm351_vm1, %v104_v4 }
 0x16e   :  { %v437_v16 = vpop.f32.mrb[0].mxu0 }
 0x16f   :  { %v873_v17 = vadd.f32 %v437_v16, %v149_v14  ;;  %v439_v18 = vpop.f32.mrb[1].mxu0 }
 0x170   :  { %v874_v19 = vadd.f32 %v439_v18, %v153_v15  ;;  %v441_v20 = vpop.f32.mrb[2].mxu0 }
 0x171   :  { %v444_v21 = vmax.f32 %v873_v17, 0.0  ;;  %v442_v22 = vpop.f32.mrb[3].mxu0 }
 0x172   :  { %v445_v23 = vmax.f32 %v874_v19, 0.0 }
 0x173   :  { %v446_v26 = vpack.c.bf16 %v444_v21, %v444_v21 }
 0x174   :  { %v447_v24 = vpack.c.bf16 %v445_v23, %v445_v23 }
 0x176   :  { %615 = vmatprep.mubr.bf16.mxu1 %v447_v24 }
 0x177   :  { %616 = vmatmul.mubr.bf16.vlgmr.msra.gmra.mrb[0].mxu1 %v446_v26 }
 0x178   :  { %854 = vmatpush3.bf16.msra.mxu1 %v968_v25  ;;  %869 = vmatprep.mubr.msk.bf16.mxu1 %vm1105_vm2, %v1104_v9 }
 0x179   :  { %855 = vmatprep.subr.bf16.mxu1 %v1104_v9 }
 0x17c   :  { %856 = vmatpush3.bf16.msra.mxu1 %v969_v27 }
 0x17d   :  { %857 = vmatprep.subr.bf16.mxu1 %v1104_v9 }
 0x180   :  { %858 = vmatpush3.bf16.msra.mxu1 %v970_v13 }
 0x181   :  { %859 = vmatprep.subr.bf16.mxu1 %v1104_v9 }
 0x184   :  { %860 = vmatpush3.bf16.msra.mxu1 %v971_v28 }
 0x185   :  { %861 = vmatprep.subr.bf16.mxu1 %v1104_v9 }
 0x188   :  { %862 = vmatpush3.bf16.msra.mxu1 %v972_v29 }
 0x189   :  { %863 = vmatprep.subr.bf16.mxu1 %v1104_v9 }
 0x18c   :  { %864 = vmatpush3.bf16.msra.mxu1 %v973_v30 }
 0x18d   :  { %865 = vmatprep.subr.bf16.mxu1 %v1104_v9 }
 0x190   :  { %866 = vmatpush3.bf16.msra.mxu1 %v974_v31 }
 0x191   :  { %867 = vmatprep.subr.bf16.mxu1 %v1104_v9 }
 0x194   :  { %868 = vmatpush3.bf16.msra.mxu1 %v975_v32 }
 0x24a   :  { %v838_v33 = vpop.f32.mrb[0].mxu1 }
 0x24b   :  { %v839_v35 = vpop.f32.mrb[1].mxu1 }
 0x24c   :  { %v840_v36 = vadd.f32 %v839_v35, %v838_v33  ;;  %v841_v37 = vpop.f32.mrb[2].mxu1 }
 0x24d   :  { %v842_v38 = vpop.f32.mrb[3].mxu1 }
 0x24e   :  { %v618_v39 = vadd.f32 %v840_v36, %v796_v34 }
 0x250   :  { %v623_v40 = vmax.f32 %v618_v39, 0.0 }
 0x252   :  { %v624_v41 = vpack.c.bf16 %v623_v40, %v623_v40 }
 0x254   :  { %870 = vmatmul.mubr.bf16.vlgmr.msra.gmra.mrb[4].mxu1 %v624_v41 }
 0x327   :  { %v730_v43 = vpop.f32.mrb[4].mxu1 }
 0x328   :  { %v731_v44 = vadd.f32 %v813_v42, %v730_v43  ;;  %v871_v45 = vpop.f32.mrb[5].mxu1 }
 0x329   :  { %v733_v46 = vpop.f32.mrb[6].mxu1 }
 0x32a   :  { %736 = vst [vmem:[#allocation10] sm:$0x3] %v731_v44  ;;  %v872_v47 = vpop.f32.mrb[7].mxu1 }
 0x32b   :  { %1075 = shalt.err (!%p1072_p8)
}
 0x32c   :  { %s1076_s6 = scalar_lea.hbm %s1243_s7, 32 }
 0x32d   :  { %p1077_p9 = scmp.ne.s32.totalorder %s1243_s7, %s1076_s6  ;;  %p1080_p10 = scmp.lt.u32.totalorder %s1076_s6, %s1243_s7 }
 0x32f   :  { %p1082_p11 = pnand %p1080_p10, %p1077_p9 }
 0x331   :  { %1085 = shalt.err (!%p1082_p11)
}
 0x332   :  { %746 = dma.vmem_to_hbm [thread:$0]  %s744_s8, 32, %s1243_s7, [#allocation4]  }
 0x333   :  { %1092 = dma.done.wait [#allocation4], 32  }
 0x334   :  { %1093 = vsyncadd [#allocation4], 4294967264 }
 0x335   :  { %750 = vsyncpa [#allocation3], 1 }
 0x336   :  { %751 = vsyncpa [#allocation6], 1 }
 0x337   :  { %752 = vsyncpa [#allocation9], 1 }
 0x338   :  { %753 = vsyncpa [#allocation4], 1 }

</bundles_post_ra>
